<compile_context>
chip_gen: v5e
topology: v5e:2x2
jax: 0.10.0
libtpu: 0.0.40
codegen_flags: <defaults>
</compile_context>

<pallas_src>
import functools

import jax
import jax.numpy as jnp
from jax.experimental import pallas as pl
from jax.experimental.pallas import tpu as pltpu


def _round_up(x: int, m: int) -> int:
    return (x + m - 1) // m * m


def _pad_to(arr, shape):
    pads = [(0, s - d) for d, s in zip(arr.shape, shape)]
    if all(p == (0, 0) for p in pads):
        return arr
    return jnp.pad(arr, pads)


@functools.lru_cache(maxsize=1)
def _single_buffer_weights_supported() -> bool:
    """Probe once whether pipeline_mode=pl.Buffered(1) lowers on this install."""
    if not hasattr(pl, "Buffered"):
        return False
    try:
        def _copy(a_ref, o_ref):
            o_ref[...] = a_ref[...]

        f = pl.pallas_call(
            _copy,
            out_shape=jax.ShapeDtypeStruct((8, 128), jnp.float32),
            grid_spec=pltpu.PrefetchScalarGridSpec(
                num_scalar_prefetch=0,
                grid=(2,),
                in_specs=[pl.BlockSpec((8, 128), lambda i: (0, 0),
                                       pipeline_mode=pl.Buffered(1))],
                out_specs=pl.BlockSpec((8, 128), lambda i: (0, 0)),
            ),
        )
        jax.block_until_ready(f(jnp.zeros((8, 128), jnp.float32)))
        return True
    except Exception:  # any lowering/runtime rejection -> plain double-buffered specs
        return False


def _ff_fused_kernel(x_ref, *refs, n_layers: int):
    """Fused MLP on one batch tile.

    refs = (w1, b1, w2, b2, ..., wL, bL, out). Weights are bf16, biases f32.
    All feature dims are padded to multiples of 128; padded weight rows/cols and
    bias lanes are zero, so padded lanes carry exact zeros through tanh and the
    chained matmuls.
    """
    o_ref = refs[-1]
    wb = refs[:-1]

    # MXU wants bf16 operands on v6e/v7x; accumulate in f32.
    h = x_ref[...].astype(jnp.bfloat16)
    acc = None
    for i in range(n_layers):
        w = wb[2 * i][...]          # bf16 weight tile (padded, zero lanes)
        b = wb[2 * i + 1][...]      # f32 bias row
        acc = jnp.dot(h, w, preferred_element_type=jnp.float32)
        acc = acc + b               # f32 VPU
        if i != n_layers - 1:
            acc = jnp.tanh(acc)     # f32 on the EUP (v5e has no bf16 EUP)
            h = acc.astype(jnp.bfloat16)   # cast down only at the next MXU input
        # TODO(synk): training-mode dropout would mask `acc` here.
    o_ref[...] = acc.astype(o_ref.dtype)   # last layer's f32 result -> output dtype


def feedforward_pallas(params, x):
    """y = FeedForward(x) (inference: dropout = identity), single fused kernel.

    params: list of (w, b) with w stored (in_features, out_features), i.e. the
    transpose of PyTorch's nn.Linear weight, so y = x @ w + b.
    """
    M, in_dim = x.shape
    n_layers = len(params)
    dims = [in_dim] + [w.shape[1] for (w, _) in params]

    # Lane-dense padding: every feature axis -> multiple of 128.
    dims_p = [_round_up(max(d, 1), 128) for d in dims]

    # Batch tiling. Rows rounded to 16 (bf16 sublane packing; also a multiple of
    # the f32 packing used by the HBM-resident x / out tiles).
    SUB = 16
    M_pad = _round_up(M, SUB)
    if M_pad <= 256:
        tm = M_pad                                   # single tile, 1 grid step
    elif M_pad <= 512:
        # Split into 2 tiles so both v7x TensorCores get grid work.
        tm = _round_up(pl.cdiv(M_pad, 2), SUB)
        M_pad = _round_up(M_pad, tm)
    else:
        tm = 256
        M_pad = _round_up(M, tm)

    x_p = _pad_to(x.astype(jnp.float32), (M_pad, dims_p[0]))

    single_buf = _single_buffer_weights_supported()
    wkw = {"pipeline_mode": pl.Buffered(1)} if single_buf else {}

    flat_inputs = [x_p]
    in_specs = [pl.BlockSpec((tm, dims_p[0]), lambda i: (i, 0))]
    for li, (w, b) in enumerate(params):
        kp, np_ = dims_p[li], dims_p[li + 1]
        flat_inputs.append(_pad_to(w.astype(jnp.bfloat16), (kp, np_)))
        flat_inputs.append(_pad_to(b.reshape(1, -1).astype(jnp.float32), (1, np_)))
        in_specs.append(pl.BlockSpec((kp, np_), lambda i: (0, 0), **wkw))  # full weight
        in_specs.append(pl.BlockSpec((1, np_), lambda i: (0, 0), **wkw))   # full bias

    out_p = dims_p[-1]

    # --- VMEM budget from the actual padded, buffered footprint -------------
    w_buf = 1 if single_buf else 2
    w_bytes = sum(dims_p[i] * dims_p[i + 1] * 2 for i in range(n_layers))   # bf16
    b_bytes = sum(dims_p[i + 1] * 4 for i in range(n_layers))               # f32
    xo_bytes = 2 * (tm * dims_p[0] * 4 + tm * out_p * 4)                    # double-buffered
    act_bytes = 2 * tm * max(dims_p) * 4                                    # in-flight activations
    footprint = xo_bytes + w_buf * (w_bytes + b_bytes) + act_bytes
    vmem_limit = min(64 * 1024 * 1024,
                     max(32 * 1024 * 1024, int(1.5 * footprint) + (4 << 20)))

    # --- Cost estimate from the PADDED shapes actually computed/moved -------
    flops = 2 * M_pad * sum(dims_p[i] * dims_p[i + 1] for i in range(n_layers))
    transcendentals = M_pad * sum(dims_p[1:-1])
    bytes_accessed = (
        4 * M_pad * dims_p[0]                                               # x (f32)
        + sum(2 * dims_p[i] * dims_p[i + 1] + 4 * dims_p[i + 1]
              for i in range(n_layers))                                     # w bf16 + b f32
        + 4 * M_pad * out_p                                                 # out (f32)
    )

    kernel = functools.partial(_ff_fused_kernel, n_layers=n_layers)
    y_p = pl.pallas_call(
        kernel,
        out_shape=jax.ShapeDtypeStruct((M_pad, out_p), jnp.float32),
        grid_spec=pltpu.PrefetchScalarGridSpec(
            num_scalar_prefetch=0,
            grid=(M_pad // tm,),
            in_specs=in_specs,
            out_specs=pl.BlockSpec((tm, out_p), lambda i: (i, 0)),
        ),
        compiler_params=pltpu.CompilerParams(
            dimension_semantics=("parallel",),
            vmem_limit_bytes=vmem_limit,
        ),
        cost_estimate=pl.CostEstimate(
            flops=flops,
            transcendentals=transcendentals,
            bytes_accessed=bytes_accessed,
        ),
    )(*flat_inputs)

    # Slice padded batch rows / padded output lanes off in the wrapper.
    return y_p[:M, : dims[-1]].astype(x.dtype)


def init_feedforward_params(key, in_dim, out_dim=1, hidden_sizes=(64, 32),
                            dtype=jnp.float32):
    """Deterministic init mimicking nn.Linear's U(-1/sqrt(fan_in), 1/sqrt(fan_in))."""
    dims = [in_dim, *hidden_sizes, out_dim]
    params = []
    for i in range(len(dims) - 1):
        fan_in, fan_out = dims[i], dims[i + 1]
        key, kw, kb = jax.random.split(key, 3)
        bound = 1.0 / jnp.sqrt(fan_in)
        # stored as (in, out)  (i.e. PyTorch weight transposed)
        w = jax.random.uniform(kw, (fan_in, fan_out), dtype, -bound, bound)
        b = jax.random.uniform(kb, (fan_out,), dtype, -bound, bound)
        params.append((w, b))
    return params


if __name__ == "__main__":
    # Small shapes consistent with the module:
    # batch=16, in_dim=32, hidden_sizes=[64, 32], out_dim=1
    batch, in_dim, out_dim = 16, 32, 1
    hidden_sizes = (64, 32)

    key = jax.random.PRNGKey(0)
    key, kx = jax.random.split(key)
    x = jax.random.normal(kx, (batch, in_dim), jnp.float32)

    params = init_feedforward_params(key, in_dim, out_dim, hidden_sizes)

    fwd = jax.jit(feedforward_pallas)
    y = jax.block_until_ready(fwd(params, x))
    assert y.shape == (batch, out_dim), y.shape

    # Reference 1: same math with matching bf16 matmul operands / f32 accumulate.
    h = x
    for idx, (w, b) in enumerate(params):
        acc = jnp.dot(h.astype(jnp.bfloat16), w.astype(jnp.bfloat16),
                      preferred_element_type=jnp.float32) + b.astype(jnp.float32)
        if idx != len(params) - 1:
            acc = jnp.tanh(acc)
            h = acc
    ref_bf16 = jax.block_until_ready(acc)
    assert jnp.allclose(y, ref_bf16, atol=2e-3, rtol=2e-3), "mismatch vs bf16 reference"

    # Reference 2: pure f32 math (semantic sanity; loose tol for bf16 operands).
    h = x
    for idx, (w, b) in enumerate(params):
        h = h @ w + b
        if idx != len(params) - 1:
            h = jnp.tanh(h)
    ref_f32 = jax.block_until_ready(h)
    assert jnp.allclose(y, ref_f32, atol=5e-2, rtol=5e-2), "mismatch vs f32 reference"

    print("KERNEL_OK")
</pallas_src>

<mosaic_0001>
module attributes {stable_mosaic.version = 11 : i64} {
  func.func @_ff_fused_kernel(%arg0: i32, %arg1: memref<16x128xf32, #tpu.memory_space<vmem>>, %arg2: memref<128x128xbf16, #tpu.memory_space<vmem>>, %arg3: memref<1x128xf32, #tpu.memory_space<vmem>>, %arg4: memref<128x128xbf16, #tpu.memory_space<vmem>>, %arg5: memref<1x128xf32, #tpu.memory_space<vmem>>, %arg6: memref<128x128xbf16, #tpu.memory_space<vmem>>, %arg7: memref<1x128xf32, #tpu.memory_space<vmem>>, %arg8: memref<16x128xf32, #tpu.memory_space<vmem>>) attributes {dimension_semantics = [#tpu.dimension_semantics<parallel>], iteration_bounds = array<i64: 1>, scalar_prefetch = 0 : i64, scratch_operands = 0 : i64, tpu.core_type = #tpu.core_type<tc>, window_params = [{transform_indices = @transform_0, window_bounds = array<i64: 16, 128>}, {pipeline_mode = #tpu.pipeline_mode<synchronous>, transform_indices = @transform_1, window_bounds = array<i64: 128, 128>}, {pipeline_mode = #tpu.pipeline_mode<synchronous>, transform_indices = @transform_2, window_bounds = array<i64: 1, 128>}, {pipeline_mode = #tpu.pipeline_mode<synchronous>, transform_indices = @transform_3, window_bounds = array<i64: 128, 128>}, {pipeline_mode = #tpu.pipeline_mode<synchronous>, transform_indices = @transform_4, window_bounds = array<i64: 1, 128>}, {pipeline_mode = #tpu.pipeline_mode<synchronous>, transform_indices = @transform_5, window_bounds = array<i64: 128, 128>}, {pipeline_mode = #tpu.pipeline_mode<synchronous>, transform_indices = @transform_6, window_bounds = array<i64: 1, 128>}, {transform_indices = @transform_7, window_bounds = array<i64: 16, 128>}]} {
    %c0 = arith.constant 0 : index
    %c0_0 = arith.constant 0 : index
    %0 = vector.load %arg1[%c0, %c0_0] : memref<16x128xf32, #tpu.memory_space<vmem>>, vector<16x128xf32>
    %1 = arith.truncf %0 : vector<16x128xf32> to vector<16x128xbf16>
    %c0_1 = arith.constant 0 : index
    %c0_2 = arith.constant 0 : index
    %2 = vector.load %arg2[%c0_1, %c0_2] : memref<128x128xbf16, #tpu.memory_space<vmem>>, vector<128x128xbf16>
    %c0_3 = arith.constant 0 : index
    %c0_4 = arith.constant 0 : index
    %3 = vector.load %arg3[%c0_3, %c0_4] : memref<1x128xf32, #tpu.memory_space<vmem>>, vector<1x128xf32>
    %cst = arith.constant dense<0.000000e+00> : vector<16x128xf32>
    %4 = tpu.matmul %1, %2, %cst {dimension_numbers = #tpu.dot_dimension_numbers<[1], [0], [0], [1], [0, 0, 1, 1], [], []>} : vector<16x128xbf16>, vector<128x128xbf16>, vector<16x128xf32> -> vector<16x128xf32>
    %5 = vector.broadcast %3 : vector<1x128xf32> to vector<16x128xf32>
    %6 = arith.addf %4, %5 : vector<16x128xf32>
    %7 = math.tanh %6 : vector<16x128xf32>
    %8 = arith.truncf %7 : vector<16x128xf32> to vector<16x128xbf16>
    %c0_5 = arith.constant 0 : index
    %c0_6 = arith.constant 0 : index
    %9 = vector.load %arg4[%c0_5, %c0_6] : memref<128x128xbf16, #tpu.memory_space<vmem>>, vector<128x128xbf16>
    %c0_7 = arith.constant 0 : index
    %c0_8 = arith.constant 0 : index
    %10 = vector.load %arg5[%c0_7, %c0_8] : memref<1x128xf32, #tpu.memory_space<vmem>>, vector<1x128xf32>
    %cst_9 = arith.constant dense<0.000000e+00> : vector<16x128xf32>
    %11 = tpu.matmul %8, %9, %cst_9 {dimension_numbers = #tpu.dot_dimension_numbers<[1], [0], [0], [1], [0, 0, 1, 1], [], []>} : vector<16x128xbf16>, vector<128x128xbf16>, vector<16x128xf32> -> vector<16x128xf32>
    %12 = vector.broadcast %10 : vector<1x128xf32> to vector<16x128xf32>
    %13 = arith.addf %11, %12 : vector<16x128xf32>
    %14 = math.tanh %13 : vector<16x128xf32>
    %15 = arith.truncf %14 : vector<16x128xf32> to vector<16x128xbf16>
    %c0_10 = arith.constant 0 : index
    %c0_11 = arith.constant 0 : index
    %16 = vector.load %arg6[%c0_10, %c0_11] : memref<128x128xbf16, #tpu.memory_space<vmem>>, vector<128x128xbf16>
    %c0_12 = arith.constant 0 : index
    %c0_13 = arith.constant 0 : index
    %17 = vector.load %arg7[%c0_12, %c0_13] : memref<1x128xf32, #tpu.memory_space<vmem>>, vector<1x128xf32>
    %cst_14 = arith.constant dense<0.000000e+00> : vector<16x128xf32>
    %18 = tpu.matmul %15, %16, %cst_14 {dimension_numbers = #tpu.dot_dimension_numbers<[1], [0], [0], [1], [0, 0, 1, 1], [], []>} : vector<16x128xbf16>, vector<128x128xbf16>, vector<16x128xf32> -> vector<16x128xf32>
    %19 = vector.broadcast %17 : vector<1x128xf32> to vector<16x128xf32>
    %20 = arith.addf %18, %19 : vector<16x128xf32>
    %c0_15 = arith.constant 0 : index
    %c0_16 = arith.constant 0 : index
    %21 = vector.load %arg8[%c0_15, %c0_16] : memref<16x128xf32, #tpu.memory_space<vmem>>, vector<16x128xf32>
    tpu.vector_store %arg8[%c0_15, %c0_16], %20 {strides = array<i32>} : memref<16x128xf32, #tpu.memory_space<vmem>>, vector<16x128xf32>,
    return
  }
  func.func @transform_0(%arg0: i32) -> (i32, i32) {
    %c0_i32 = arith.constant 0 : i32
    %c0_i32_0 = arith.constant 0 : i32
    return %arg0, %c0_i32 : i32, i32
  }
  func.func @transform_1(%arg0: i32) -> (i32, i32) {
    %c0_i32 = arith.constant 0 : i32
    %c0_i32_0 = arith.constant 0 : i32
    %c0_i32_1 = arith.constant 0 : i32
    return %c0_i32, %c0_i32_0 : i32, i32
  }
  func.func @transform_2(%arg0: i32) -> (i32, i32) {
    %c0_i32 = arith.constant 0 : i32
    %c0_i32_0 = arith.constant 0 : i32
    %c0_i32_1 = arith.constant 0 : i32
    return %c0_i32, %c0_i32_0 : i32, i32
  }
  func.func @transform_3(%arg0: i32) -> (i32, i32) {
    %c0_i32 = arith.constant 0 : i32
    %c0_i32_0 = arith.constant 0 : i32
    %c0_i32_1 = arith.constant 0 : i32
    return %c0_i32, %c0_i32_0 : i32, i32
  }
  func.func @transform_4(%arg0: i32) -> (i32, i32) {
    %c0_i32 = arith.constant 0 : i32
    %c0_i32_0 = arith.constant 0 : i32
    %c0_i32_1 = arith.constant 0 : i32
    return %c0_i32, %c0_i32_0 : i32, i32
  }
  func.func @transform_5(%arg0: i32) -> (i32, i32) {
    %c0_i32 = arith.constant 0 : i32
    %c0_i32_0 = arith.constant 0 : i32
    %c0_i32_1 = arith.constant 0 : i32
    return %c0_i32, %c0_i32_0 : i32, i32
  }
  func.func @transform_6(%arg0: i32) -> (i32, i32) {
    %c0_i32 = arith.constant 0 : i32
    %c0_i32_0 = arith.constant 0 : i32
    %c0_i32_1 = arith.constant 0 : i32
    return %c0_i32, %c0_i32_0 : i32, i32
  }
  func.func @transform_7(%arg0: i32) -> (i32, i32) {
    %c0_i32 = arith.constant 0 : i32
    %c0_i32_0 = arith.constant 0 : i32
    return %arg0, %c0_i32 : i32, i32
  }
}

</mosaic_0001>

<bundles_post_ra>
// kernel: feedforward_pallas.1
= control target key start
LH: loop header
LB: loop body
LE: loop exit
PB: predicated region body
PF: predicated region fallthrough
CT: control target
= control target key end

     0   :  { %s551_s1 = inlined_call_operand.vmem [shape: bf16[128,128], index: 1, kind: input, shape index: {}]   ;;  %s552_s3 = inlined_call_operand.vmem [shape: bf16[128,128], index: 3, kind: input, shape index: {}]   ;;  %s553_s2 = inlined_call_operand.vmem [shape: f32[1,128], index: 2, kind: input, shape index: {}]   ;;  %s554_s0 = inlined_call_operand.vmem [shape: f32[16,128], index: 0, kind: input, shape index: {}]   ;;  %s555_s4 = inlined_call_operand.vmem [shape: f32[1,128], index: 4, kind: input, shape index: {}]   ;;  %s556_s5 = inlined_call_operand.vmem [shape: bf16[128,128], index: 5, kind: input, shape index: {}]   ;;  %s557_s6 = inlined_call_operand.vmem [shape: f32[1,128], index: 6, kind: input, shape index: {}]   ;;  %s558_s7 = inlined_call_operand.vmem [shape: f32[16,128], index: 7, kind: output, shape index: {}]  }
   0x1   :  { %v390_v0 = vld [vmem:[%s551_s1 + $0x38] sm:$0xff]  ;;  %v389_v1 = vld [vmem:[%s551_s1 + $0x30] sm:$0xff]  ;;  %v388_v4 = vld [vmem:[%s551_s1 + $0x28] sm:$0xff] }
   0x2   :  { %97 = vmatpush.bf16.msra.mxu0 %v390_v0  ;;  %v398_v2 = vld [vmem:[%s552_s3 + $0x38] sm:$0xff]  ;;  %v397_v3 = vld [vmem:[%s552_s3 + $0x30] sm:$0xff]  ;;  %v396_v5 = vld [vmem:[%s552_s3 + $0x28] sm:$0xff] }
   0x3   :  { %182 = vmatpush.bf16.msra.mxu1 %v398_v2  ;;  %v387_v6 = vld [vmem:[%s551_s1 + $0x20] sm:$0xff]  ;;  %v386_v7 = vld [vmem:[%s551_s1 + $0x18] sm:$0xff]  ;;  %v385_v8 = vld [vmem:[%s551_s1 + $0x10] sm:$0xff] }
   0x4   :  { %v384_v9 = vld [vmem:[%s551_s1 + $0x8] sm:$0xff]  ;;  %v383_v10 = vld [vmem:[%s551_s1] sm:$0xff]  ;;  %v394_v15 = vld [vmem:[%s552_s3 + $0x18] sm:$0xff] }
   0x5   :  { %v26_v11 = vld [vmem:[%s554_s0] sm:$0xff]  ;;  %v27_v12 = vld [vmem:[%s554_s0 + $0x8] sm:$0xff]  ;;  %v393_v16 = vld [vmem:[%s552_s3 + $0x10] sm:$0xff] }
   0x6   :  { %98 = vmatpush.bf16.msra.mxu0 %v389_v1  ;;  %v28_v13 = vpack.c.bf16 %v27_v12, %v26_v11  ;;  %v395_v14 = vld [vmem:[%s552_s3 + $0x20] sm:$0xff]  ;;  %v392_v17 = vld [vmem:[%s552_s3 + $0x8] sm:$0xff]  ;;  %v406_v19 = vld [vmem:[%s556_s5 + $0x38] sm:$0xff] }
   0x7   :  { %183 = vmatpush.bf16.msra.mxu1 %v397_v3  ;;  %v391_v18 = vld [vmem:[%s552_s3] sm:$0xff]  ;;  %267 = vmatpush.bf16.msra.mxu2 %v406_v19  ;;  %v405_v20 = vld [vmem:[%s556_s5 + $0x30] sm:$0xff]  ;;  %v404_v21 = vld [vmem:[%s556_s5 + $0x28] sm:$0xff] }
   0x8   :  { %v407_v23 = vld [vmem:[%s553_s2] ss:$0 sm:$0xff]  ;;  %v402_v31 = vld [vmem:[%s556_s5 + $0x18] sm:$0xff]  ;;  %v401_v32 = vld [vmem:[%s556_s5 + $0x10] sm:$0xff] }
   0x9   :  { %v403_v30 = vld [vmem:[%s556_s5 + $0x20] sm:$0xff]  ;;  %v400_v33 = vld [vmem:[%s556_s5 + $0x8] sm:$0xff] }
   0xa   :  { %99 = vmatpush.bf16.msra.mxu0 %v388_v4  ;;  %v399_v34 = vld [vmem:[%s556_s5] sm:$0xff] }
   0xb   :  { %184 = vmatpush.bf16.msra.mxu1 %v396_v5  ;;  %268 = vmatpush.bf16.msra.mxu2 %v405_v20  ;;  %v408_v36 = vld [vmem:[%s555_s4] ss:$0 sm:$0xff] }
   0xc   :  { %v409_v43 = vld [vmem:[%s557_s6] ss:$0 sm:$0xff] }
   0xe   :  { %100 = vmatpush.bf16.msra.mxu0 %v387_v6 }
   0xf   :  { %185 = vmatpush.bf16.msra.mxu1 %v395_v14  ;;  %269 = vmatpush.bf16.msra.mxu2 %v404_v21 }
  0x12   :  { %101 = vmatpush.bf16.msra.mxu0 %v386_v7 }
  0x13   :  { %186 = vmatpush.bf16.msra.mxu1 %v394_v15  ;;  %270 = vmatpush.bf16.msra.mxu2 %v403_v30 }
  0x16   :  { %102 = vmatpush.bf16.msra.mxu0 %v385_v8 }
  0x17   :  { %187 = vmatpush.bf16.msra.mxu1 %v393_v16  ;;  %271 = vmatpush.bf16.msra.mxu2 %v402_v31 }
  0x1a   :  { %103 = vmatpush.bf16.msra.mxu0 %v384_v9 }
  0x1b   :  { %188 = vmatpush.bf16.msra.mxu1 %v392_v17  ;;  %272 = vmatpush.bf16.msra.mxu2 %v401_v32 }
  0x1e   :  { %104 = vmatpush.bf16.msra.mxu0 %v383_v10 }
  0x1f   :  { %189 = vmatpush.bf16.msra.mxu1 %v391_v18  ;;  %273 = vmatpush.bf16.msra.mxu2 %v400_v33 }
  0x21   :  { %105 = vmatmul.bf16.vlgmr.msra.gmra.mxu0 %v28_v13 }
  0x23   :  { %274 = vmatpush.bf16.msra.mxu2 %v399_v34 }
  0x9e   :  { %v106_v22 = vpop.f32.mrf.mxu0 }
  0x9f   :  { %v107_v24 = vadd.f32 %v407_v23, %v106_v22 }
  0xa1   :  { %410 = vtanh.f32 %v107_v24 }
  0xa6   :  { %v108_v25 = vpop.f32.mrf.mxu0 }
  0xa7   :  { %v109_v26 = vadd.f32 %v407_v23, %v108_v25  ;;  %v411_v27 = vpop.eup %410 }
  0xa9   :  { %412 = vtanh.f32 %v109_v26 }
  0xaf   :  { %v413_v28 = vpop.eup %412 }
  0xb0   :  { %v113_v29 = vpack.c.bf16 %v413_v28, %v411_v27 }
  0xb2   :  { %190 = vmatmul.bf16.vlgmr.msra.gmra.mxu1 %v113_v29 }
 0x12f   :  { %v191_v35 = vpop.f32.mrf.mxu1 }
 0x130   :  { %v192_v37 = vadd.f32 %v408_v36, %v191_v35 }
 0x132   :  { %414 = vtanh.f32 %v192_v37 }
 0x137   :  { %v193_v38 = vpop.f32.mrf.mxu1 }
 0x138   :  { %v194_v39 = vadd.f32 %v408_v36, %v193_v38  ;;  %v415_v40 = vpop.eup %414 }
 0x13a   :  { %416 = vtanh.f32 %v194_v39 }
 0x140   :  { %v417_v41 = vpop.eup %416 }
 0x141   :  { %v198_v42 = vpack.c.bf16 %v417_v41, %v415_v40 }
 0x143   :  { %275 = vmatmul.bf16.vlgmr.msra.gmra.mxu2 %v198_v42 }
 0x1c6   :  { %v276_v44 = vpop.f32.mrf.mxu2 }
 0x1c7   :  { %v277_v45 = vadd.f32 %v409_v43, %v276_v44 }
 0x1c9   :  { %281 = vst [vmem:[%s558_s7] sm:$0xff] %v277_v45 }
 0x1ce   :  { %v278_v46 = vpop.f32.mrf.mxu2 }
 0x1cf   :  { %v279_v47 = vadd.f32 %v409_v43, %v278_v46 }
 0x1d1   :  { %282 = vst [vmem:[%s558_s7 + $0x8] sm:$0xff] %v279_v47 }

</bundles_post_ra>
